<compile_context>
chip_gen: v7x
topology: tpu7x:2x2x1
jax: 0.10.0
libtpu: 0.0.40
codegen_flags: <defaults>
</compile_context>

<pallas_src>
import math

import jax
import jax.numpy as jnp
from jax.experimental import pallas as pl
from jax.experimental.pallas import tpu as pltpu


# Per-grid-step footprint targets (padded VMEM bytes of input+output block).
_MIN_BLOCK_COST = 1 * 1024 * 1024   # amortize per-step overhead
_MAX_BLOCK_COST = 8 * 1024 * 1024   # 2x-buffered in+out stays well under v7x VMEM


def _parse_permute_pattern(pattern: str):
    """Mirror of Rearrange.__init__ for the parenthesis-free case."""
    assert "(" not in pattern and ")" not in pattern, (
        "reshape patterns fall back to einops.rearrange; not a kernel")
    left_expr, right_expr = pattern.split(" -> ")
    left_syms = left_expr.split()
    right_syms = right_expr.split()
    # For each output symbol, its position on the input side.  (The PyTorch
    # module swaps the variable names but computes exactly this permutation.)
    return tuple(left_syms.index(s) for s in right_syms)


def _merge_adjacent_axes(in_shape, perm):
    """Merge runs of axes that stay adjacent and in-order across the permute.

    Returns (merged_in_shape, merged_perm).  The wrapper-side reshapes that
    realize the merge are contiguous-axis merges, i.e. free metadata ops.
    """
    groups = []                     # runs of input axes, in OUTPUT order
    for a in perm:
        if groups and a == groups[-1][-1] + 1:
            groups[-1].append(a)
        else:
            groups.append([a])
    groups_by_input = sorted(groups, key=lambda g: g[0])
    merged_in_shape = tuple(
        math.prod(in_shape[a] for a in g) for g in groups_by_input)
    new_axis_of = {g[0]: i for i, g in enumerate(groups_by_input)}
    merged_perm = tuple(new_axis_of[g[0]] for g in groups)
    return merged_in_shape, merged_perm


def _round_up(v, m):
    return ((v + m - 1) // m) * m


def _padded_block_bytes(shape, itemsize):
    """Approximate VMEM footprint of one block (last two dims tile-padded)."""
    sublane = max(8, 8 * (4 // max(1, itemsize)))
    if len(shape) < 2:
        return _round_up(max(1, math.prod(shape)), 128) * itemsize
    lead = math.prod(shape[:-2])
    return (lead * _round_up(shape[-2], sublane) * _round_up(shape[-1], 128)
            * itemsize)


def _make_index_map(selectors):
    """selectors[d] is None (block index 0) or the grid axis to use."""
    def index_map(*grid_idx):
        return tuple(0 if s is None else grid_idx[s] for s in selectors)
    return index_map


def _make_kernel(perm, in_block, out_block):
    moved = [a for a in perm if in_block[a] != 1]
    if moved == sorted(moved):
        # Non-unit axes keep their relative order: only unit (grid) dims move,
        # so the block is a pure copy -> pure-DMA path, no XLU work.
        if tuple(in_block) == tuple(out_block):
            def kernel(x_ref, o_ref):
                o_ref[...] = x_ref[...]
        else:
            def kernel(x_ref, o_ref):
                o_ref[...] = x_ref[...].reshape(out_block)   # unit-dims only
    else:
        def kernel(x_ref, o_ref):
            o_ref[...] = jnp.transpose(x_ref[...], perm)
    return kernel


def rearrange_permute(x: jax.Array, pattern: str) -> jax.Array:
    """Pallas-backed equivalent of Rearrange(pattern)(x) for permute patterns."""
    perm = _parse_permute_pattern(pattern)
    n = len(perm)
    assert n == x.ndim, (pattern, x.shape)
    out_shape = tuple(x.shape[p] for p in perm)
    if perm == tuple(range(n)):
        return x                               # identity permute

    in_shape_s, perm_s = _merge_adjacent_axes(x.shape, perm)
    m = len(perm_s)                            # m >= 2 for any non-identity perm
    out_shape_s = tuple(in_shape_s[p] for p in perm_s)
    inv_s = [0] * m
    for j, a in enumerate(perm_s):
        inv_s[a] = j
    itemsize = jnp.dtype(x.dtype).itemsize

    # ---- choose how many leading output axes become grid axes --------------
    # The last two input axes and last two output axes must stay whole inside
    # each block (full-dim exemption of the (8,128) rule); that bounds the
    # number of grid axes by g_max.
    g_max = max(0, min(m - 2, inv_s[m - 1], inv_s[m - 2]))

    def block_cost(g):
        in_blk = tuple(1 if inv_s[a] < g else in_shape_s[a] for a in range(m))
        out_blk = (1,) * g + out_shape_s[g:]
        cost = (_padded_block_bytes(in_blk, itemsize)
                + _padded_block_bytes(out_blk, itemsize))
        return in_blk, out_blk, cost

    g = g_max
    while g > 0:
        _, _, cost = block_cost(g)
        _, _, bigger = block_cost(g - 1)
        if cost >= _MIN_BLOCK_COST or bigger > _MAX_BLOCK_COST:
            break
        g -= 1

    in_block, out_block, cost = block_cost(g)
    grid = tuple(out_shape_s[:g]) if g > 0 else (1,)
    dim_sem = ("parallel",) * g if g > 0 else ("arbitrary",)

    in_sel = tuple(inv_s[a] if inv_s[a] < g else None for a in range(m))
    out_sel = tuple(j if j < g else None for j in range(m))

    # Double-buffered in+out blocks plus relayout/spill headroom.
    vmem_limit = int(min(100 * 1024 * 1024,
                         max(32 * 1024 * 1024, 3 * cost + (8 << 20))))

    out_merged = pl.pallas_call(
        _make_kernel(perm_s, in_block, out_block),
        out_shape=jax.ShapeDtypeStruct(out_shape_s, x.dtype),
        grid_spec=pltpu.PrefetchScalarGridSpec(
            num_scalar_prefetch=0,
            grid=grid,
            in_specs=[pl.BlockSpec(in_block, _make_index_map(in_sel))],
            out_specs=pl.BlockSpec(out_block, _make_index_map(out_sel)),
        ),
        compiler_params=pltpu.CompilerParams(
            dimension_semantics=dim_sem,
            vmem_limit_bytes=vmem_limit,
        ),
        cost_estimate=pl.CostEstimate(
            flops=0, transcendentals=0,
            bytes_accessed=2 * x.size * itemsize),
    )(x.reshape(in_shape_s))

    return out_merged.reshape(out_shape)


# TODO(synk): patterns containing '(' / ')' (einops reshape-merge/split branch
# of the module) are metadata reshapes composed with permutes; not implemented
# as a kernel here.


if __name__ == "__main__":
    key = jax.random.PRNGKey(0)
    cases = [
        ("b c h w -> b h w c", (2, 4, 16, 16)),     # canonical NCHW -> NHWC
        ("b c h w -> b h w c", (16, 128, 32, 32)),  # large enough to tile the grid
        ("b c h w -> c b h w", (2, 4, 16, 16)),     # leading-axis (copy-ish) permute
        ("b c h w -> b c h w", (2, 4, 16, 16)),     # identity
    ]
    for pattern, shape in cases:
        key, sub = jax.random.split(key)
        x = jax.random.normal(sub, shape, dtype=jnp.float32)
        out = jax.block_until_ready(rearrange_permute(x, pattern))
        ref = jnp.transpose(x, _parse_permute_pattern(pattern))
        assert out.shape == ref.shape, (pattern, out.shape, ref.shape)
        assert out.dtype == ref.dtype, (pattern, out.dtype, ref.dtype)
        assert bool(jnp.all(out == ref)), f"mismatch for pattern {pattern!r}"
    print("KERNEL_OK")
</pallas_src>

<mosaic_0001>
module attributes {stable_mosaic.version = 11 : i64} {
  func.func @kernel(%arg0: i32, %arg1: memref<2x4x256xf32, #tpu.memory_space<vmem>>, %arg2: memref<2x256x4xf32, #tpu.memory_space<vmem>>) attributes {dimension_semantics = [#tpu.dimension_semantics<arbitrary>], iteration_bounds = array<i64: 1>, scalar_prefetch = 0 : i64, scratch_operands = 0 : i64, tpu.core_type = #tpu.core_type<tc>, window_params = [{pipeline_mode = #tpu.pipeline_mode<synchronous>, transform_indices = @transform_0, window_bounds = array<i64: 2, 4, 256>}, {pipeline_mode = #tpu.pipeline_mode<synchronous>, transform_indices = @transform_1, window_bounds = array<i64: 2, 256, 4>}]} {
    %c0 = arith.constant 0 : index
    %c0_0 = arith.constant 0 : index
    %c0_1 = arith.constant 0 : index
    %0 = vector.load %arg1[%c0, %c0_0, %c0_1] : memref<2x4x256xf32, #tpu.memory_space<vmem>>, vector<2x4x256xf32>
    %1 = tpu.transpose %0, [0, 2, 1] : vector<2x4x256xf32> -> vector<2x256x4xf32>
    %c0_2 = arith.constant 0 : index
    %c0_3 = arith.constant 0 : index
    %c0_4 = arith.constant 0 : index
    %2 = vector.load %arg2[%c0_2, %c0_3, %c0_4] : memref<2x256x4xf32, #tpu.memory_space<vmem>>, vector<2x256x4xf32>
    tpu.vector_store %arg2[%c0_2, %c0_3, %c0_4], %1 {strides = array<i32>} : memref<2x256x4xf32, #tpu.memory_space<vmem>>, vector<2x256x4xf32>,
    return
  }
  func.func @transform_0(%arg0: i32) -> (i32, i32, i32) {
    %c0_i32 = arith.constant 0 : i32
    %c0_i32_0 = arith.constant 0 : i32
    %c0_i32_1 = arith.constant 0 : i32
    %c0_i32_2 = arith.constant 0 : i32
    return %c0_i32, %c0_i32_0, %c0_i32_1 : i32, i32, i32
  }
  func.func @transform_1(%arg0: i32) -> (i32, i32, i32) {
    %c0_i32 = arith.constant 0 : i32
    %c0_i32_0 = arith.constant 0 : i32
    %c0_i32_1 = arith.constant 0 : i32
    %c0_i32_2 = arith.constant 0 : i32
    return %c0_i32, %c0_i32_0, %c0_i32_1 : i32, i32, i32
  }
}

</mosaic_0001>

<bundles_post_ra>
// kernel: tpu_custom_call.1
= control target key start
LH: loop header
LB: loop body
LE: loop exit
PB: predicated region body
PF: predicated region fallthrough
CT: control target
= control target key end

     0   :  { %6 = vsyncpa [#allocation3], 0  ;;  %s258_s6 = smov [#allocation2]   ;;  %s539_s0 = inlined_call_operand.hbm [shape: f32[2,4,256], index: 0, kind: input, shape index: {}]   ;;  %s540_s1 = inlined_call_operand.vmem [shape: f32[2,256,4], index: 1, kind: output, shape index: {}]  }
   0x1   :  { %s12_s7 = sshll.u32 %s258_s6, 4  ;;  %s234_s10 = scalar_lea.hbm %s539_s0, 256  ;;  %s13_s7 = int_to_ptr.vmem [resolvable:$true] %s12_s7 }
   0x2   :  { %p235_p0 = scmp.ne.s32.totalorder %s539_s0, %s234_s10  ;;  %p238_p1 = scmp.lt.u32.totalorder %s234_s10, %s539_s0 }
   0x4   :  { %p240_p2 = pnand %p238_p1, %p235_p0 }
   0x6   :  { %243 = shalt.err (!%p240_p2)
}
   0x7   :  { %s244_s15 = scalar_lea.vmem %s13_s7, 256  ;;  %p249_p4 = scmp.lt.s32.totalorder %s13_s7, %s13_s7 }
   0x8   :  { %p245_p3 = scmp.ne.s32.totalorder %s13_s7, %s244_s15  ;;  %p250_p5 = scmp.lt.s32.totalorder %s244_s15, %s244_s15 }
   0xa   :  { %p251_p6 = por %p250_p5, %p249_p4 }
   0xc   :  { %p252_p7 = pnand %p251_p6, %p245_p3 }
   0xe   :  { %255 = shalt.err (!%p252_p7)
}
   0xf   :  { %s259_s16 = smov 128   ;;  %s260_s17 = smov 8  }
  0x10   :  { %18 = dma.hbm_to_vmem [thread:$0]  %s539_s0, 256, %s13_s7, [#allocation3], %s259_s16, %s259_s16, %s260_s17  }
  0x11   :  { %256 = dma.done.wait [#allocation3], 256  }
  0x12   :  { %257 = vsyncadd [#allocation3], 4294967040  ;;  %v23_v0 = vld [vmem:[#allocation2 + $0x8] sm:$0xff]  ;;  %v22_v1 = vld [vmem:[#allocation2] sm:$0xff]  ;;  %vm158_vm0 = vcmask 31744  }
  0x13   :  { %94 = vxpose.xlu1.b32.start.end [1/1] (short) %v23_v0, 128  ;;  %30 = vxpose.xlu0.b32.start.end [1/1] (short) %v22_v1, 128  ;;  %v27_v2 = vcombine.high %v23_v0, %v23_v0  ;;  %v26_v3 = vcombine.high %v22_v1, %v22_v1 }
  0x50   :  { %126 = vxpose.xlu1.b32.start.end [1/1] (short) %v27_v2, 128  ;;  %62 = vxpose.xlu0.b32.start.end [1/1] (short) %v26_v3, 128 }
  0x93   :  { %v110_v4 = vpop.trf.xlu1  ;;  %v46_v5 = vpop.trf.xlu0 }
  0x94   :  { %191 = vst.msk [vmem:[%s540_s1 + $0x100] sm:$0xff] %vm158_vm0, %v110_v4  ;;  %159 = vst.msk [vmem:[%s540_s1] sm:$0xff] %vm158_vm0, %v46_v5 }
  0x97   :  { %v111_v6 = vpop.trf.xlu1  ;;  %v47_v7 = vpop.trf.xlu0 }
  0x98   :  { %192 = vst.msk [vmem:[%s540_s1 + $0x108] sm:$0xff] %vm158_vm0, %v111_v6  ;;  %160 = vst.msk [vmem:[%s540_s1 + $0x8] sm:$0xff] %vm158_vm0, %v47_v7 }
  0x9b   :  { %v112_v8 = vpop.trf.xlu1  ;;  %v48_v9 = vpop.trf.xlu0 }
  0x9c   :  { %193 = vst.msk [vmem:[%s540_s1 + $0x110] sm:$0xff] %vm158_vm0, %v112_v8  ;;  %161 = vst.msk [vmem:[%s540_s1 + $0x10] sm:$0xff] %vm158_vm0, %v48_v9 }
  0x9f   :  { %v113_v10 = vpop.trf.xlu1  ;;  %v49_v11 = vpop.trf.xlu0 }
  0xa0   :  { %194 = vst.msk [vmem:[%s540_s1 + $0x118] sm:$0xff] %vm158_vm0, %v113_v10  ;;  %162 = vst.msk [vmem:[%s540_s1 + $0x18] sm:$0xff] %vm158_vm0, %v49_v11 }
  0xa3   :  { %v114_v12 = vpop.trf.xlu1  ;;  %v50_v13 = vpop.trf.xlu0 }
  0xa4   :  { %195 = vst.msk [vmem:[%s540_s1 + $0x120] sm:$0xff] %vm158_vm0, %v114_v12  ;;  %163 = vst.msk [vmem:[%s540_s1 + $0x20] sm:$0xff] %vm158_vm0, %v50_v13 }
  0xa7   :  { %v115_v14 = vpop.trf.xlu1  ;;  %v51_v15 = vpop.trf.xlu0 }
  0xa8   :  { %196 = vst.msk [vmem:[%s540_s1 + $0x128] sm:$0xff] %vm158_vm0, %v115_v14  ;;  %164 = vst.msk [vmem:[%s540_s1 + $0x28] sm:$0xff] %vm158_vm0, %v51_v15 }
  0xab   :  { %v116_v16 = vpop.trf.xlu1  ;;  %v52_v17 = vpop.trf.xlu0 }
  0xac   :  { %197 = vst.msk [vmem:[%s540_s1 + $0x130] sm:$0xff] %vm158_vm0, %v116_v16  ;;  %165 = vst.msk [vmem:[%s540_s1 + $0x30] sm:$0xff] %vm158_vm0, %v52_v17 }
  0xaf   :  { %v117_v18 = vpop.trf.xlu1  ;;  %v53_v19 = vpop.trf.xlu0 }
  0xb0   :  { %198 = vst.msk [vmem:[%s540_s1 + $0x138] sm:$0xff] %vm158_vm0, %v117_v18  ;;  %166 = vst.msk [vmem:[%s540_s1 + $0x38] sm:$0xff] %vm158_vm0, %v53_v19 }
  0xb3   :  { %v118_v20 = vpop.trf.xlu1  ;;  %v54_v21 = vpop.trf.xlu0 }
  0xb4   :  { %199 = vst.msk [vmem:[%s540_s1 + $0x140] sm:$0xff] %vm158_vm0, %v118_v20  ;;  %167 = vst.msk [vmem:[%s540_s1 + $0x40] sm:$0xff] %vm158_vm0, %v54_v21 }
  0xb7   :  { %v119_v22 = vpop.trf.xlu1  ;;  %v55_v23 = vpop.trf.xlu0 }
  0xb8   :  { %200 = vst.msk [vmem:[%s540_s1 + $0x148] sm:$0xff] %vm158_vm0, %v119_v22  ;;  %168 = vst.msk [vmem:[%s540_s1 + $0x48] sm:$0xff] %vm158_vm0, %v55_v23 }
  0xbb   :  { %v120_v24 = vpop.trf.xlu1  ;;  %v56_v25 = vpop.trf.xlu0 }
  0xbc   :  { %201 = vst.msk [vmem:[%s540_s1 + $0x150] sm:$0xff] %vm158_vm0, %v120_v24  ;;  %169 = vst.msk [vmem:[%s540_s1 + $0x50] sm:$0xff] %vm158_vm0, %v56_v25 }
  0xbf   :  { %v121_v26 = vpop.trf.xlu1  ;;  %v57_v27 = vpop.trf.xlu0 }
  0xc0   :  { %202 = vst.msk [vmem:[%s540_s1 + $0x158] sm:$0xff] %vm158_vm0, %v121_v26  ;;  %170 = vst.msk [vmem:[%s540_s1 + $0x58] sm:$0xff] %vm158_vm0, %v57_v27 }
  0xc3   :  { %v122_v28 = vpop.trf.xlu1  ;;  %v58_v29 = vpop.trf.xlu0 }
  0xc4   :  { %203 = vst.msk [vmem:[%s540_s1 + $0x160] sm:$0xff] %vm158_vm0, %v122_v28  ;;  %171 = vst.msk [vmem:[%s540_s1 + $0x60] sm:$0xff] %vm158_vm0, %v58_v29 }
  0xc7   :  { %v123_v30 = vpop.trf.xlu1  ;;  %v59_v31 = vpop.trf.xlu0 }
  0xc8   :  { %204 = vst.msk [vmem:[%s540_s1 + $0x168] sm:$0xff] %vm158_vm0, %v123_v30  ;;  %172 = vst.msk [vmem:[%s540_s1 + $0x68] sm:$0xff] %vm158_vm0, %v59_v31 }
  0xcb   :  { %v124_v32 = vpop.trf.xlu1  ;;  %v60_v33 = vpop.trf.xlu0 }
  0xcc   :  { %205 = vst.msk [vmem:[%s540_s1 + $0x170] sm:$0xff] %vm158_vm0, %v124_v32  ;;  %173 = vst.msk [vmem:[%s540_s1 + $0x70] sm:$0xff] %vm158_vm0, %v60_v33 }
  0xcf   :  { %v125_v34 = vpop.trf.xlu1  ;;  %v61_v35 = vpop.trf.xlu0 }
  0xd0   :  { %206 = vst.msk [vmem:[%s540_s1 + $0x178] sm:$0xff] %vm158_vm0, %v125_v34  ;;  %174 = vst.msk [vmem:[%s540_s1 + $0x78] sm:$0xff] %vm158_vm0, %v61_v35 }
  0xd3   :  { %v142_v36 = vpop.trf.xlu1  ;;  %v78_v37 = vpop.trf.xlu0 }
  0xd4   :  { %207 = vst.msk [vmem:[%s540_s1 + $0x180] sm:$0xff] %vm158_vm0, %v142_v36  ;;  %175 = vst.msk [vmem:[%s540_s1 + $0x80] sm:$0xff] %vm158_vm0, %v78_v37 }
  0xd7   :  { %v143_v38 = vpop.trf.xlu1  ;;  %v79_v39 = vpop.trf.xlu0 }
  0xd8   :  { %208 = vst.msk [vmem:[%s540_s1 + $0x188] sm:$0xff] %vm158_vm0, %v143_v38  ;;  %176 = vst.msk [vmem:[%s540_s1 + $0x88] sm:$0xff] %vm158_vm0, %v79_v39 }
  0xdb   :  { %v144_v40 = vpop.trf.xlu1  ;;  %v80_v41 = vpop.trf.xlu0 }
  0xdc   :  { %209 = vst.msk [vmem:[%s540_s1 + $0x190] sm:$0xff] %vm158_vm0, %v144_v40  ;;  %177 = vst.msk [vmem:[%s540_s1 + $0x90] sm:$0xff] %vm158_vm0, %v80_v41 }
  0xdf   :  { %v145_v42 = vpop.trf.xlu1  ;;  %v81_v43 = vpop.trf.xlu0 }
  0xe0   :  { %210 = vst.msk [vmem:[%s540_s1 + $0x198] sm:$0xff] %vm158_vm0, %v145_v42  ;;  %178 = vst.msk [vmem:[%s540_s1 + $0x98] sm:$0xff] %vm158_vm0, %v81_v43 }
  0xe3   :  { %v146_v44 = vpop.trf.xlu1  ;;  %v82_v45 = vpop.trf.xlu0 }
  0xe4   :  { %211 = vst.msk [vmem:[%s540_s1 + $0x1a0] sm:$0xff] %vm158_vm0, %v146_v44  ;;  %179 = vst.msk [vmem:[%s540_s1 + $0xa0] sm:$0xff] %vm158_vm0, %v82_v45 }
  0xe7   :  { %v147_v46 = vpop.trf.xlu1  ;;  %v83_v47 = vpop.trf.xlu0 }
  0xe8   :  { %212 = vst.msk [vmem:[%s540_s1 + $0x1a8] sm:$0xff] %vm158_vm0, %v147_v46  ;;  %180 = vst.msk [vmem:[%s540_s1 + $0xa8] sm:$0xff] %vm158_vm0, %v83_v47 }
  0xeb   :  { %v148_v48 = vpop.trf.xlu1  ;;  %v84_v49 = vpop.trf.xlu0 }
  0xec   :  { %213 = vst.msk [vmem:[%s540_s1 + $0x1b0] sm:$0xff] %vm158_vm0, %v148_v48  ;;  %181 = vst.msk [vmem:[%s540_s1 + $0xb0] sm:$0xff] %vm158_vm0, %v84_v49 }
  0xef   :  { %v149_v50 = vpop.trf.xlu1  ;;  %v85_v51 = vpop.trf.xlu0 }
  0xf0   :  { %214 = vst.msk [vmem:[%s540_s1 + $0x1b8] sm:$0xff] %vm158_vm0, %v149_v50  ;;  %182 = vst.msk [vmem:[%s540_s1 + $0xb8] sm:$0xff] %vm158_vm0, %v85_v51 }
  0xf3   :  { %v150_v52 = vpop.trf.xlu1  ;;  %v86_v53 = vpop.trf.xlu0 }
  0xf4   :  { %215 = vst.msk [vmem:[%s540_s1 + $0x1c0] sm:$0xff] %vm158_vm0, %v150_v52  ;;  %183 = vst.msk [vmem:[%s540_s1 + $0xc0] sm:$0xff] %vm158_vm0, %v86_v53 }
  0xf7   :  { %v151_v54 = vpop.trf.xlu1  ;;  %v87_v55 = vpop.trf.xlu0 }
  0xf8   :  { %216 = vst.msk [vmem:[%s540_s1 + $0x1c8] sm:$0xff] %vm158_vm0, %v151_v54  ;;  %184 = vst.msk [vmem:[%s540_s1 + $0xc8] sm:$0xff] %vm158_vm0, %v87_v55 }
  0xfb   :  { %v152_v56 = vpop.trf.xlu1  ;;  %v88_v57 = vpop.trf.xlu0 }
  0xfc   :  { %217 = vst.msk [vmem:[%s540_s1 + $0x1d0] sm:$0xff] %vm158_vm0, %v152_v56  ;;  %185 = vst.msk [vmem:[%s540_s1 + $0xd0] sm:$0xff] %vm158_vm0, %v88_v57 }
  0xff   :  { %v153_v58 = vpop.trf.xlu1  ;;  %v89_v59 = vpop.trf.xlu0 }
 0x100   :  { %218 = vst.msk [vmem:[%s540_s1 + $0x1d8] sm:$0xff] %vm158_vm0, %v153_v58  ;;  %186 = vst.msk [vmem:[%s540_s1 + $0xd8] sm:$0xff] %vm158_vm0, %v89_v59 }
 0x103   :  { %v154_v60 = vpop.trf.xlu1  ;;  %v90_v61 = vpop.trf.xlu0 }
 0x104   :  { %219 = vst.msk [vmem:[%s540_s1 + $0x1e0] sm:$0xff] %vm158_vm0, %v154_v60  ;;  %187 = vst.msk [vmem:[%s540_s1 + $0xe0] sm:$0xff] %vm158_vm0, %v90_v61 }
 0x107   :  { %v155_v62 = vpop.trf.xlu1  ;;  %v91_v63 = vpop.trf.xlu0 }
 0x108   :  { %220 = vst.msk [vmem:[%s540_s1 + $0x1e8] sm:$0xff] %vm158_vm0, %v155_v62  ;;  %188 = vst.msk [vmem:[%s540_s1 + $0xe8] sm:$0xff] %vm158_vm0, %v91_v63 }
 0x10b   :  { %v156_v0 = vpop.trf.xlu1  ;;  %v92_v1 = vpop.trf.xlu0 }
 0x10c   :  { %221 = vst.msk [vmem:[%s540_s1 + $0x1f0] sm:$0xff] %vm158_vm0, %v156_v0  ;;  %189 = vst.msk [vmem:[%s540_s1 + $0xf0] sm:$0xff] %vm158_vm0, %v92_v1 }
 0x10f   :  { %v157_v2 = vpop.trf.xlu1  ;;  %v93_v3 = vpop.trf.xlu0 }
 0x110   :  { %222 = vst.msk [vmem:[%s540_s1 + $0x1f8] sm:$0xff] %vm158_vm0, %v157_v2  ;;  %190 = vst.msk [vmem:[%s540_s1 + $0xf8] sm:$0xff] %vm158_vm0, %v93_v3 }
 0x111   :  { %227 = vsyncpa [#allocation3], 1 }

</bundles_post_ra>
